<compile_context>
chip_gen: v5e
topology: v5e:2x2
jax: 0.10.0
libtpu: 0.0.40
codegen_flags: <defaults>
</compile_context>

<pallas_src>
import jax
import jax.numpy as jnp
import numpy as np
from jax.experimental import pallas as pl
from jax.experimental.pallas import tpu as pltpu


def intra_attention_kernel(x_ref, w_ref, b_ref, p_ref, out_ref):
    # x_ref: (Bblk, S, D), w_ref: (D, D), b_ref: (1, D), p_ref: (1, D)
    # out_ref: (Bblk, S)
    bblk, s, d = x_ref.shape

    # Flatten batch*seq so the MXU sees one tall (Bblk*S, D) matmul instead of
    # Bblk tiny (S, D) ones.  torch.bmm(W.repeat(B,1,1), inp.transpose(2,1))
    # is, per row, x @ W^T  (contract dim 1 of both operands).
    x = x_ref[...].reshape(bblk * s, d)
    wx = jax.lax.dot_general(
        x, w_ref[...], (((1,), (1,)), ((), ())),
        preferred_element_type=jnp.float32,
    )                                                        # (Bblk*S, D) f32 acc

    # tanh on the EUP, bias broadcast per feature (bias_word.repeat over seq).
    squish = jnp.tanh(wx + b_ref[...].astype(jnp.float32))   # (Bblk*S, D)

    # logits[b, s] = sum_d squish[b, s, d] * proj[d]  -> (Bblk, S), S on lanes.
    weighted = (squish * p_ref[...].astype(jnp.float32)).reshape(bblk, s, d)
    logits = jnp.sum(weighted, axis=-1)                      # (Bblk, S) lane reduce

    # Numerically stable softmax over the sequence axis (PyTorch Softmax(dim=1)),
    # now a lane-axis softmax over the whole batch tile at once.
    # TODO(synk): if S ever grows beyond what fits in one VMEM block, this
    # single-pass softmax must become a two-pass / online softmax.
    m = jnp.max(logits, axis=-1, keepdims=True)              # (Bblk, 1)
    e = jnp.exp(logits - m)                                  # EUP
    denom = jnp.sum(e, axis=-1, keepdims=True)               # (Bblk, 1)
    out_ref[...] = (e / denom).astype(out_ref.dtype)         # (Bblk, S) unmasked store


def _choose_block_b(B, S, D, itemsize):
    """Pick a batch tile: >= ~256 MXU rows per step, well under VMEM budget.

    Budget is kept conservative (~4 MiB per double-buffered input block) so the
    same choice is safe on v7x's smaller 64 MiB VMEM (32 MiB scoped default).
    """
    budget_bytes = 4 << 20
    max_b_vmem = max(1, budget_bytes // max(1, S * D * itemsize))
    target_b = max(1, pl.cdiv(256, S))          # Bblk * S >= 256 rows into the MXU
    bblk = min(B, max_b_vmem, max(target_b, 8))
    if bblk < B:
        # Keep the (Bblk, S) output block sublane-aligned (multiple of 8).
        bblk = max(8, (bblk // 8) * 8)
        bblk = min(bblk, B)
        if bblk % 8 != 0:
            bblk = B
    return bblk


def intra_attention(inp, weight_W_word, bias_word, weight_proj_word, *, block_b=None):
    """inp: (B, S, D) -> (B, S) attention weights (softmax over S)."""
    B, S, D = inp.shape
    b_row = bias_word.reshape(1, D)          # (D, 1) -> lane-dense (1, D)
    p_row = weight_proj_word.reshape(1, D)   # (D, 1) -> lane-dense (1, D)

    if block_b is None:
        block_b = _choose_block_b(B, S, D, jnp.dtype(inp.dtype).itemsize)
    grid_b = pl.cdiv(B, block_b)

    out = pl.pallas_call(
        intra_attention_kernel,
        out_shape=jax.ShapeDtypeStruct((B, S), inp.dtype),
        grid_spec=pltpu.PrefetchScalarGridSpec(
            num_scalar_prefetch=0,
            grid=(grid_b,),
            in_specs=[
                # Batched input tile per grid step (contiguous, pipelinable DMA).
                pl.BlockSpec((block_b, S, D), lambda b: (b, 0, 0)),
                # Parameters: constant block index -> stay resident in VMEM.
                pl.BlockSpec((D, D), lambda b: (0, 0)),
                pl.BlockSpec((1, D), lambda b: (0, 0)),
                pl.BlockSpec((1, D), lambda b: (0, 0)),
            ],
            # Lane-dense output block, no trailing singleton dim.
            out_specs=pl.BlockSpec((block_b, S), lambda b: (b, 0)),
        ),
        compiler_params=pltpu.CompilerParams(
            # Batch axis is embarrassingly parallel -> shards across the 2 TCs
            # on v7x; no-op on v5e/v6e.
            dimension_semantics=("parallel",),
        ),
    )(inp, weight_W_word, b_row, p_row)

    return out   # already (B, S) == word_attn.squeeze(2)


def intra_attention_ref(inp, W, b, p):
    """Pure-JAX replica of the PyTorch forward, for verification."""
    squish = jnp.tanh(jnp.einsum("dk,bsk->bds", W, inp) + b[None, :, :])
    logits = jnp.einsum("bds,do->bso", squish, p)[..., 0]    # (B, S)
    return jax.nn.softmax(logits, axis=1)


if __name__ == "__main__":
    hidden_dim = 16
    bidirectional = True
    D = hidden_dim * (2 if bidirectional else 1)   # 32
    B, S = 2, 8

    key = jax.random.PRNGKey(0)
    k1, k2, k3, k4 = jax.random.split(key, 4)
    # deterministic init matching nn.Parameter(...).uniform_(-0.1, 0.1)
    weight_W_word = jax.random.uniform(k1, (D, D), jnp.float32, -0.1, 0.1)
    bias_word = jax.random.uniform(k2, (D, 1), jnp.float32, -0.1, 0.1)
    weight_proj_word = jax.random.uniform(k3, (D, 1), jnp.float32, -0.1, 0.1)
    x = jax.random.normal(k4, (B, S, D), jnp.float32)

    out = jax.block_until_ready(
        intra_attention(x, weight_W_word, bias_word, weight_proj_word)
    )
    expected = intra_attention_ref(x, weight_W_word, bias_word, weight_proj_word)
    assert out.shape == (B, S)
    np.testing.assert_allclose(
        np.asarray(out), np.asarray(expected), rtol=1e-5, atol=1e-5
    )

    # Second check: larger batch so the grid has > 1 step (exercises tiling).
    B2 = 64
    x2 = jax.random.normal(jax.random.PRNGKey(1), (B2, S, D), jnp.float32)
    out2 = jax.block_until_ready(
        intra_attention(x2, weight_W_word, bias_word, weight_proj_word)
    )
    expected2 = intra_attention_ref(x2, weight_W_word, bias_word, weight_proj_word)
    assert out2.shape == (B2, S)
    np.testing.assert_allclose(
        np.asarray(out2), np.asarray(expected2), rtol=1e-5, atol=1e-5
    )

    print("KERNEL_OK")
</pallas_src>

<mosaic_0001>
module attributes {stable_mosaic.version = 11 : i64} {
  func.func @intra_attention_kernel(%arg0: i32, %arg1: memref<2x8x32xf32, #tpu.memory_space<vmem>>, %arg2: memref<32x32xf32, #tpu.memory_space<vmem>>, %arg3: memref<1x32xf32, #tpu.memory_space<vmem>>, %arg4: memref<1x32xf32, #tpu.memory_space<vmem>>, %arg5: memref<2x8xf32, #tpu.memory_space<vmem>>) attributes {dimension_semantics = [#tpu.dimension_semantics<parallel>], iteration_bounds = array<i64: 1>, scalar_prefetch = 0 : i64, scratch_operands = 0 : i64, tpu.core_type = #tpu.core_type<tc>, window_params = [{transform_indices = @transform_0, window_bounds = array<i64: 2, 8, 32>}, {pipeline_mode = #tpu.pipeline_mode<synchronous>, transform_indices = @transform_1, window_bounds = array<i64: 32, 32>}, {pipeline_mode = #tpu.pipeline_mode<synchronous>, transform_indices = @transform_2, window_bounds = array<i64: 1, 32>}, {pipeline_mode = #tpu.pipeline_mode<synchronous>, transform_indices = @transform_3, window_bounds = array<i64: 1, 32>}, {transform_indices = @transform_4, window_bounds = array<i64: 2, 8>}]} {
    %c0 = arith.constant 0 : index
    %c0_0 = arith.constant 0 : index
    %c0_1 = arith.constant 0 : index
    %0 = vector.load %arg1[%c0, %c0_0, %c0_1] : memref<2x8x32xf32, #tpu.memory_space<vmem>>, vector<2x8x32xf32>
    %1 = vector.shape_cast %0 : vector<2x8x32xf32> to vector<16x32xf32>
    %c0_2 = arith.constant 0 : index
    %c0_3 = arith.constant 0 : index
    %2 = vector.load %arg2[%c0_2, %c0_3] : memref<32x32xf32, #tpu.memory_space<vmem>>, vector<32x32xf32>
    %cst = arith.constant dense<0.000000e+00> : vector<16x32xf32>
    %3 = tpu.matmul %1, %2, %cst {dimension_numbers = #tpu.dot_dimension_numbers<[1], [1], [0], [0], [0, 0, 1, 0], [], []>} : vector<16x32xf32>, vector<32x32xf32>, vector<16x32xf32> -> vector<16x32xf32>
    %c0_4 = arith.constant 0 : index
    %c0_5 = arith.constant 0 : index
    %4 = vector.load %arg3[%c0_4, %c0_5] : memref<1x32xf32, #tpu.memory_space<vmem>>, vector<1x32xf32>
    %5 = vector.broadcast %4 : vector<1x32xf32> to vector<16x32xf32>
    %6 = arith.addf %3, %5 : vector<16x32xf32>
    %7 = math.tanh %6 : vector<16x32xf32>
    %c0_6 = arith.constant 0 : index
    %c0_7 = arith.constant 0 : index
    %8 = vector.load %arg4[%c0_6, %c0_7] : memref<1x32xf32, #tpu.memory_space<vmem>>, vector<1x32xf32>
    %9 = vector.broadcast %8 : vector<1x32xf32> to vector<16x32xf32>
    %10 = arith.mulf %7, %9 : vector<16x32xf32>
    %11 = vector.shape_cast %10 : vector<16x32xf32> to vector<2x8x32xf32>
    %cst_8 = arith.constant dense<0.000000e+00> : vector<2x8xf32>
    %12 = vector.multi_reduction <add>, %11, %cst_8 [2] : vector<2x8x32xf32> to vector<2x8xf32>
    %cst_9 = arith.constant dense<0xFF800000> : vector<2xf32>
    %13 = vector.multi_reduction <maximumf>, %12, %cst_9 [1] : vector<2x8xf32> to vector<2xf32>
    %14 = vector.shape_cast %13 : vector<2xf32> to vector<2x1xf32>
    %15 = vector.broadcast %14 : vector<2x1xf32> to vector<2x8xf32>
    %16 = arith.subf %12, %15 : vector<2x8xf32>
    %17 = math.exp %16 : vector<2x8xf32>
    %cst_10 = arith.constant dense<0.000000e+00> : vector<2xf32>
    %18 = vector.multi_reduction <add>, %17, %cst_10 [1] : vector<2x8xf32> to vector<2xf32>
    %19 = vector.shape_cast %18 : vector<2xf32> to vector<2x1xf32>
    %20 = vector.broadcast %19 : vector<2x1xf32> to vector<2x8xf32>
    %21 = arith.divf %17, %20 : vector<2x8xf32>
    %c0_11 = arith.constant 0 : index
    %c0_12 = arith.constant 0 : index
    %22 = vector.load %arg5[%c0_11, %c0_12] : memref<2x8xf32, #tpu.memory_space<vmem>>, vector<2x8xf32>
    tpu.vector_store %arg5[%c0_11, %c0_12], %21 {strides = array<i32>} : memref<2x8xf32, #tpu.memory_space<vmem>>, vector<2x8xf32>,
    return
  }
  func.func @transform_0(%arg0: i32) -> (i32, i32, i32) {
    %c0_i32 = arith.constant 0 : i32
    %c0_i32_0 = arith.constant 0 : i32
    %c0_i32_1 = arith.constant 0 : i32
    return %arg0, %c0_i32, %c0_i32_0 : i32, i32, i32
  }
  func.func @transform_1(%arg0: i32) -> (i32, i32) {
    %c0_i32 = arith.constant 0 : i32
    %c0_i32_0 = arith.constant 0 : i32
    %c0_i32_1 = arith.constant 0 : i32
    return %c0_i32, %c0_i32_0 : i32, i32
  }
  func.func @transform_2(%arg0: i32) -> (i32, i32) {
    %c0_i32 = arith.constant 0 : i32
    %c0_i32_0 = arith.constant 0 : i32
    %c0_i32_1 = arith.constant 0 : i32
    return %c0_i32, %c0_i32_0 : i32, i32
  }
  func.func @transform_3(%arg0: i32) -> (i32, i32) {
    %c0_i32 = arith.constant 0 : i32
    %c0_i32_0 = arith.constant 0 : i32
    %c0_i32_1 = arith.constant 0 : i32
    return %c0_i32, %c0_i32_0 : i32, i32
  }
  func.func @transform_4(%arg0: i32) -> (i32, i32) {
    %c0_i32 = arith.constant 0 : i32
    %c0_i32_0 = arith.constant 0 : i32
    return %arg0, %c0_i32 : i32, i32
  }
}

</mosaic_0001>

<bundles_post_ra>
// kernel: tpu_custom_call.1
= control target key start
LH: loop header
LB: loop body
LE: loop exit
PB: predicated region body
PF: predicated region fallthrough
CT: control target
= control target key end

     0   :  { %9 = vsyncpa [#allocation3], 0  ;;  %s404_s0 = inlined_call_operand.hbm [shape: f32[2,8,32], index: 0, kind: input, shape index: {}]   ;;  %s405_s1 = inlined_call_operand.hbm [shape: f32[32,32], index: 1, kind: input, shape index: {}]   ;;  %s406_s2 = inlined_call_operand.vmem [shape: f32[1,32], index: 2, kind: input, shape index: {}]   ;;  %s407_s3 = inlined_call_operand.vmem [shape: f32[1,32], index: 3, kind: input, shape index: {}]   ;;  %s408_s4 = inlined_call_operand.hbm [shape: f32[2,8], index: 4, kind: output, shape index: {}]  }
   0x1   :  { %10 = vsyncpa [#allocation6], 0 }
   0x2   :  { %11 = vsyncpa [#allocation4], 0  ;;  %s16_s17 = sshll.u32 %s404_s0, 4  ;;  %s332_s18 = smov [#allocation2]   ;;  %s17_s17 = int_to_ptr.hbm [resolvable:$true] %s16_s17 }
   0x3   :  { %s18_s19 = sshll.u32 %s332_s18, 4  ;;  %s29_s22 = sshll.u32 %s405_s1, 4  ;;  %s19_s19 = int_to_ptr.vmem [resolvable:$true] %s18_s19  ;;  %s30_s22 = int_to_ptr.hbm [resolvable:$true] %s29_s22 }
   0x4   :  { %s333_s23 = smov 128   ;;  %s334_s24 = smov 8  }
   0x5   :  { %24 = dma.hbm_to_vmem [thread:$0]  %s17_s17, 256, %s19_s19, [#allocation3], %s333_s23, %s333_s23, %s334_s24  }
   0x6   :  { %s335_s25 = smov [#allocation5]  }
   0x7   :  { %s31_s26 = sshll.u32 %s335_s25, 4  ;;  %s32_s26 = int_to_ptr.vmem [resolvable:$true] %s31_s26 }
   0x8   :  { %37 = dma.hbm_to_vmem [thread:$0]  %s30_s22, 512, %s32_s26, [#allocation6], %s333_s23, %s333_s23, %s334_s24  }
   0x9   :  { %326 = dma.done.wait [#allocation3], 256  }
   0xa   :  { %327 = vsyncadd [#allocation3], 4294967040 }
   0xb   :  { %328 = dma.done.wait [#allocation6], 512  }
   0xc   :  { %329 = vsyncadd [#allocation6], 4294966784  ;;  %vm60_vm0 = vcmask 261120   ;;  %v55_v0 = vld [vmem:[#allocation5 + $0x18] sm:$0xff]  ;;  %v54_v1 = vld [vmem:[#allocation5 + $0x10] sm:$0xff]  ;;  %v118_v19 = vlaneseq  ;;  %vm122_vm1 = vcmask 1041409  }
   0xd   :  { %221 = vmatpush.xpose.msk.msra.mxu0 %vm60_vm0, %v55_v0  ;;  %227 = vmatpush.xpose.msk.msra.mxu1 %vm60_vm0, %v55_v0  ;;  %v53_v2 = vld [vmem:[#allocation5 + $0x8] sm:$0xff]  ;;  %v52_v3 = vld [vmem:[#allocation5] sm:$0xff]  ;;  %v50_v4 = vld [vmem:[#allocation2] sm:$0xff]  ;;  %vm125_vm2 = vcmask 58368   ;;  %v336_v26 = vmov 0   ;;  %s210_s5 = sshll.u32 %s408_s4, 4  ;;  %s211_s5 = int_to_ptr.hbm [resolvable:$true] %s210_s5 }
   0xe   :  { %v51_v5 = vld [vmem:[#allocation2 + $0x8] sm:$0xff]  ;;  %v240_v6 = vld [vmem:[%s406_s2] ss:$0 sm:$0xff]  ;;  %v387_v20 = vand.u32 127, %v118_v19  ;;  %238 = vset.pattern.permute.xlu2 %v336_v26  ;;  %237 = vset.pattern.permute.xlu1 %v336_v26  ;;  %s337_s2 = smov [#allocation7]  }
   0xf   :  { %v241_v11 = vld [vmem:[%s407_s3] ss:$0 sm:$0xff]  ;;  %239 = vset.pattern.permute.xlu0 %v336_v26  ;;  %s208_s3 = sshll.u32 %s337_s2, 4  ;;  %s209_s3 = int_to_ptr.vmem [resolvable:$true] %s208_s3 }
  0x11   :  { %222 = vmatpush.xpose.msk.msra.mxu0 %vm60_vm0, %v54_v1  ;;  %228 = vmatpush.xpose.msk.msra.mxu1 %vm60_vm0, %v54_v1 }
  0x15   :  { %223 = vmatpush.xpose.msk.msra.mxu0 %vm60_vm0, %v53_v2  ;;  %229 = vmatpush.xpose.msk.msra.mxu1 %vm60_vm0, %v53_v2 }
  0x19   :  { %224 = vmatpush.xpose.msk.msra.mxu0 %vm60_vm0, %v52_v3  ;;  %230 = vmatpush.xpose.msk.msra.mxu1 %vm60_vm0, %v52_v3 }
  0x1c   :  { %225 = vmatmul.msk.f32.vlgmr.msra.gmra.mxu0 %vm60_vm0, %v50_v4  ;;  %226 = vmatmul.msk.f32.vlgmr.msra.gmra.mxu1 %vm60_vm0, %v51_v5 }
  0x99   :  { %v96_v7 = vpop.f32.mrf.mxu0  ;;  %v99_v8 = vpop.f32.mrf.mxu1 }
  0x9a   :  { %v97_v9 = vadd.f32 %v240_v6, %v96_v7  ;;  %v100_v10 = vadd.f32 %v240_v6, %v99_v8 }
  0x9c   :  { %242 = vtanh.f32 %v97_v9 }
  0x9d   :  { %244 = vtanh.f32 %v100_v10 }
  0xa2   :  { %v243_v12 = vpop.eup %242 }
  0xa3   :  { %v108_v13 = vmul.f32 %v243_v12, %v241_v11  ;;  %v245_v14 = vpop.eup %244 }
  0xa4   :  { %v109_v16 = vmul.f32 %v245_v14, %v241_v11 }
  0xa5   :  { %v110_v15 = vsel %vm60_vm0, %v108_v13, 0.0 }
  0xa6   :  { %111 = vadd.xlane.f32.xlu0 %v110_v15  ;;  %v113_v17 = vsel %vm60_vm0, %v109_v16, 0.0 }
  0xae   :  { %114 = vadd.xlane.f32.xlu0 %v113_v17 }
 0x119   :  { %v112_v18 = vpop.xlane.xlu0 %111 }
 0x11a   :  { %v120_v22 = vperm.slane %v112_v18, %v387_v20 }
 0x121   :  { %v115_v21 = vpop.xlane.xlu0 %114 }
 0x122   :  { %v121_v23 = vperm.slane %v115_v21, %v387_v20 }
 0x124   :  { %v123_v24 = vsel %vm122_vm1, %v121_v23, %v120_v22 }
 0x125   :  { %v126_v25 = vsel %vm125_vm2, %v123_v24, -inf }
 0x126   :  { %127 = vmax.xlane.f32.xlu1 %v126_v25 }
 0x199   :  { %v128_v27 = vpop.xlane.xlu1 %127 }
 0x19a   :  { %v130_v28 = vperm.slane %v128_v27, 0  ;;  %v131_v29 = vperm.slane %v128_v27, 1 }
 0x19c   :  { %v134_v30 = vsub.f32 %v112_v18, %v130_v28  ;;  %v135_v31 = vsub.f32 %v115_v21, %v131_v29 }
 0x19e   :  { %v136_v32 = vmul.f32 1.442695, %v134_v30  ;;  %v138_v33 = vmul.f32 1.442695, %v135_v31 }
 0x1a0   :  { %246 = vpow2.f32 %v136_v32 }
 0x1a1   :  { %248 = vpow2.f32 %v138_v33 }
 0x1a6   :  { %v247_v34 = vpop.eup %246 }
 0x1a7   :  { %v249_v35 = vpop.eup %248  ;;  %143 = vperm.xlu1 %237, %v247_v34  }
 0x1a8   :  { %146 = vperm.xlu2 %238, %v249_v35  }
 0x202   :  { %v147_v36 = vpop.permute.xlu2 %146 }
 0x203   :  { %v149_v38 = vperm.slane %v147_v36, %v387_v20 }
 0x219   :  { %v144_v37 = vpop.permute.xlu1 %143 }
 0x21a   :  { %v148_v39 = vperm.slane %v144_v37, %v387_v20 }
 0x21c   :  { %v150_v40 = vsel %vm122_vm1, %v149_v38, %v148_v39 }
 0x21d   :  { %v152_v41 = vsel %vm125_vm2, %v150_v40, 0.0 }
 0x21e   :  { %153 = vadd.xlane.f32.xlu2 %v152_v41 }
 0x291   :  { %v154_v42 = vpop.xlane.xlu2 %153 }
 0x292   :  { %v156_v43 = vperm.slane %v154_v42, 0  ;;  %v157_v44 = vperm.slane %v154_v42, 1 }
 0x294   :  { %250 = vrcp.f32 %v156_v43  ;;  %v171_v51 = vand.u32 2147483648, %v156_v43  ;;  %v186_v52 = vand.u32 2147483648, %v157_v44  ;;  %v169_v54 = vand.u32 2147483647, %v156_v43 }
 0x295   :  { %252 = vrcp.f32 %v157_v44  ;;  %v184_v56 = vand.u32 2147483647, %v157_v44  ;;  %vm165_vm5 = vweird.f32 %v156_v43  ;;  %vm180_vm6 = vweird.f32 %v157_v44 }
 0x296   :  { %v172_v59 = vor.u32 1.1754944e-38, %v171_v51  ;;  %v187_v60 = vor.u32 1.1754944e-38, %v186_v52  ;;  %vm170_vm9 = vcmp.eq.f32.partialorder %v169_v54, 8.507059e+37 }
 0x297   :  { %vm185_vm10 = vcmp.eq.f32.partialorder %v184_v56, 8.507059e+37 }
 0x29a   :  { %v251_v45 = vpop.eup %250 }
 0x29b   :  { %v253_v46 = vpop.eup %252  ;;  %v161_v47 = vmul.f32 %v251_v45, %v156_v43  ;;  %vm166_vm3 = vweird.f32 %v251_v45 }
 0x29c   :  { %v176_v48 = vmul.f32 %v253_v46, %v157_v44  ;;  %vm181_vm4 = vweird.f32 %v253_v46  ;;  %vm167_vm7 = vmor %vm165_vm5, %vm166_vm3 }
 0x29d   :  { %v162_v49 = vsub.f32 1.0, %v161_v47  ;;  %vm182_vm8 = vmor %vm180_vm6, %vm181_vm4 }
 0x29e   :  { %v177_v50 = vsub.f32 1.0, %v176_v48 }
 0x29f   :  { %v163_v53 = vmul.f32 %v251_v45, %v162_v49 }
 0x2a0   :  { %v178_v55 = vmul.f32 %v253_v46, %v177_v50 }
 0x2a1   :  { %v164_v57 = vadd.f32 %v251_v45, %v163_v53 }
 0x2a2   :  { %v179_v58 = vadd.f32 %v253_v46, %v178_v55 }
 0x2a3   :  { %v168_v61 = vsel %vm167_vm7, %v251_v45, %v164_v57 }
 0x2a4   :  { %v183_v62 = vsel %vm182_vm8, %v253_v46, %v179_v58  ;;  %v173_v63 = vsel %vm170_vm9, %v172_v59, %v168_v61 }
 0x2a5   :  { %v188_v0 = vsel %vm185_vm10, %v187_v60, %v183_v62  ;;  %v174_v1 = vmul.f32 %v247_v34, %v173_v63 }
 0x2a6   :  { %v189_v2 = vmul.f32 %v249_v35, %v188_v0 }
 0x2a7   :  { %193 = vperm.xlu0 %239, %v174_v1  }
 0x2a8   :  { %196 = vperm.xlu1 %237, %v189_v2  }
 0x319   :  { %v194_v3 = vpop.permute.xlu0 %193 }
 0x31a   :  { %v197_v4 = vpop.permute.xlu1 %196  ;;  %v198_v5 = vperm.slane %v194_v3, %v387_v20 }
 0x31b   :  { %v199_v6 = vperm.slane %v197_v4, %v387_v20 }
 0x31d   :  { %v200_v7 = vsel %vm122_vm1, %v199_v6, %v198_v5 }
 0x31e   :  { %202 = vst.msk [vmem:[#allocation7] sm:$0x3] %vm125_vm2, %v200_v7 }
 0x31f   :  { %213 = dma.vmem_to_hbm [thread:$0]  %s209_s3, 32, %s211_s5, [#allocation4]  }
 0x320   :  { %330 = dma.done.wait [#allocation4], 32  }
 0x321   :  { %331 = vsyncadd [#allocation4], 4294967264 }
 0x322   :  { %218 = vsyncpa [#allocation3], 1 }
 0x323   :  { %219 = vsyncpa [#allocation6], 1 }
 0x324   :  { %220 = vsyncpa [#allocation4], 1 }

</bundles_post_ra>
